<compile_context>
chip_gen: v5e
topology: v5e:2x2
jax: 0.10.0
libtpu: 0.0.40
codegen_flags: <defaults>
</compile_context>

<pallas_src>
import numpy as np
import jax
import jax.numpy as jnp
from jax.experimental import pallas as pl
from jax.experimental.pallas import tpu as pltpu


def patchcut_gt(x, patch_size):
    H, W = x.shape
    P = int(patch_size)
    # Same padding formula as the PyTorch module: H % P == 0 gives pad_h = P (a
    # full extra reflected band) -- intentional match to the reference module.
    pad_h = P - H % P
    pad_w = P - W % P
    # Hard preconditions: ReflectionPad2d itself requires pad < dim.
    assert pad_h < H and pad_w < W, "ReflectionPad2d requires pad < dim size"
    assert P % 8 == 0, "patch_size must be a multiple of 8 (TPU sublane tiling)"
    H_pad, W_pad = H + pad_h, W + pad_w
    n_h, n_w = H_pad // P, W_pad // P
    d = P - pad_h           # direct (non-reflected) rows in the last row band
    dw = P - pad_w          # direct (non-reflected) cols in the last col patch

    # Reflected boundary, pre-flipped by XLA (pure data movement, exact for all
    # dtypes).  Padded row H+a == source row H-2-a; padded col W+c == W-2-c.
    bot_refl = jnp.flip(x[H - 1 - pad_h:H - 1, :], axis=0)              # (pad_h, W)
    bottom_block = (jnp.concatenate([x[H - d:H, :], bot_refl], axis=0)
                    if d > 0 else bot_refl)                             # (P, W): last padded band, original cols
    right_top = jnp.flip(x[:, W - 1 - pad_w:W - 1], axis=1)             # (H, pad_w)
    right_bot = jnp.flip(right_top[H - 1 - pad_h:H - 1, :], axis=0)     # (pad_h, pad_w): corner
    right_block = jnp.concatenate([right_top, right_bot], axis=0)       # (H_pad, pad_w): right padded cols

    def kernel(x_ref, bot_ref, right_ref, o_ref):
        i = pl.program_id(0)

        def emit(src_ref):
            # src_ref: (P, W) block holding this band's rows of the original W
            # columns (already row-reflected when it is bot_ref).
            for j in range(n_w - 1):                           # fully-direct patches
                o_ref[0, j] = src_ref[:, j * P:(j + 1) * P]
            if dw > 0:                                         # last patch: direct cols ...
                o_ref[0, n_w - 1, :, :dw] = src_ref[:, (n_w - 1) * P:W]
            o_ref[0, n_w - 1, :, dw:] = right_ref[...]         # ... then reflected cols

        if n_h > 1:
            @pl.when(i < n_h - 1)
            def _():
                emit(x_ref)

        @pl.when(i == n_h - 1)
        def _():
            emit(bot_ref)

    if n_h > 1:
        # Clamp the last step to the previous block index: that block is already
        # resident (no extra DMA) and the last band reads bot_ref instead.
        x_spec = pl.BlockSpec((P, W), lambda i: (jnp.minimum(i, n_h - 2), 0))
        x_block_elems = P * W
    else:
        x_spec = pl.BlockSpec((H, W), lambda i: (0, 0))        # unused, tiny, resident
        x_block_elems = H * W

    # Resident/blocked VMEM (double-buffered): x band, bottom band, right strip
    # band, output band.  Scales with P*W_pad, not H*W.
    itemsize = jnp.dtype(x.dtype).itemsize
    vmem_needed = 2 * itemsize * (x_block_elems + P * W + P * pad_w + P * W_pad) + (2 << 20)
    try:
        vmem_cap = int(getattr(pltpu.get_tpu_info(), "vmem_capacity_bytes",
                               128 * 1024 * 1024))
    except Exception:
        vmem_cap = 64 * 1024 * 1024
    vmem_limit = int(min(max(vmem_needed, 32 * 1024 * 1024), int(0.8 * vmem_cap)))

    patches = pl.pallas_call(
        kernel,
        out_shape=jax.ShapeDtypeStruct((n_h, n_w, P, P), x.dtype),
        grid=(n_h,),
        in_specs=[
            x_spec,                                            # this band's rows of x
            pl.BlockSpec((P, W), lambda i: (0, 0)),            # last padded band (resident)
            pl.BlockSpec((P, pad_w), lambda i: (i, 0)),        # right reflected cols, this band
        ],
        out_specs=pl.BlockSpec((1, n_w, P, P), lambda i: (i, 0, 0, 0)),
        compiler_params=pltpu.CompilerParams(
            dimension_semantics=("parallel",),
            vmem_limit_bytes=vmem_limit),
    )(x, bottom_block, right_block)

    # Row-major patch order over the padded image (matches the module's
    # torch.cat order); this reshape is contiguous -> free.
    return patches.reshape(n_h * n_w, P, P)


def _reference(x, patch_size):
    # Pure-JAX reference replicating the PyTorch forward.
    H, W = x.shape
    P = patch_size
    pad_h = P - H % P
    pad_w = P - W % P
    xp = jnp.pad(x, ((0, pad_h), (0, pad_w)), mode="reflect")
    n_h, n_w = xp.shape[0] // P, xp.shape[1] // P
    return xp.reshape(n_h, P, n_w, P).transpose(0, 2, 1, 3).reshape(n_h * n_w, P, P)


if __name__ == "__main__":
    # Small-but-valid config: patch_size=128 (module default is 224), image
    # 160x200 -> padded to 256x256, 2x2 = 4 patches (exercises both reflected
    # rows and reflected columns plus the corner).
    H, W, P = 160, 200, 128
    key = jax.random.PRNGKey(0)
    x = jax.random.normal(key, (H, W), dtype=jnp.float32)

    out = jax.block_until_ready(patchcut_gt(x, P))
    ref = _reference(x, P)

    assert out.shape == ref.shape == (4, P, P)
    # Pure data-movement op: result must match bit-exactly.
    np.testing.assert_array_equal(np.asarray(out), np.asarray(ref))
    print("KERNEL_OK")
</pallas_src>

<mosaic_0001>
module attributes {stable_mosaic.version = 11 : i64} {
  func.func @kernel(%arg0: i32, %arg1: memref<128x200xf32, #tpu.memory_space<vmem>>, %arg2: memref<128x200xf32, #tpu.memory_space<vmem>>, %arg3: memref<128x56xf32, #tpu.memory_space<vmem>>, %arg4: memref<1x2x128x128xf32, #tpu.memory_space<vmem>>) attributes {dimension_semantics = [#tpu.dimension_semantics<parallel>], iteration_bounds = array<i64: 2>, scalar_prefetch = 0 : i64, scratch_operands = 0 : i64, tpu.core_type = #tpu.core_type<tc>, window_params = [{transform_indices = @transform_0, window_bounds = array<i64: 128, 200>}, {pipeline_mode = #tpu.pipeline_mode<synchronous>, transform_indices = @transform_1, window_bounds = array<i64: 128, 200>}, {transform_indices = @transform_2, window_bounds = array<i64: 128, 56>}, {transform_indices = @transform_3, window_bounds = array<i64: 1, 2, 128, 128>}]} {
    %c1_i32 = arith.constant 1 : i32
    %0 = arith.cmpi slt, %arg0, %c1_i32 : i32
    %1 = arith.extui %0 : i1 to i32
    %c0_i32 = arith.constant 0 : i32
    %2 = arith.cmpi ne, %1, %c0_i32 : i32
    scf.if %2 {
      %c0 = arith.constant 0 : index
      %c0_2 = arith.constant 0 : index
      %6 = vector.load %arg1[%c0, %c0_2] : memref<128x200xf32, #tpu.memory_space<vmem>>, vector<128x128xf32>
      %c0_3 = arith.constant 0 : index
      %c0_4 = arith.constant 0 : index
      %c0_5 = arith.constant 0 : index
      %c0_6 = arith.constant 0 : index
      %7 = vector.load %arg4[%c0_3, %c0_4, %c0_5, %c0_6] : memref<1x2x128x128xf32, #tpu.memory_space<vmem>>, vector<1x1x128x128xf32>
      %8 = vector.shape_cast %7 : vector<1x1x128x128xf32> to vector<128x128xf32>
      %9 = vector.shape_cast %6 : vector<128x128xf32> to vector<1x1x128x128xf32>
      tpu.vector_store %arg4[%c0_3, %c0_4, %c0_5, %c0_6], %9 {strides = array<i32>} : memref<1x2x128x128xf32, #tpu.memory_space<vmem>>, vector<1x1x128x128xf32>,
      %c0_7 = arith.constant 0 : index
      %c128 = arith.constant 128 : index
      %10 = vector.load %arg1[%c0_7, %c128] : memref<128x200xf32, #tpu.memory_space<vmem>>, vector<128x72xf32>
      %c0_8 = arith.constant 0 : index
      %c1 = arith.constant 1 : index
      %c0_9 = arith.constant 0 : index
      %c0_10 = arith.constant 0 : index
      %11 = vector.load %arg4[%c0_8, %c1, %c0_9, %c0_10] : memref<1x2x128x128xf32, #tpu.memory_space<vmem>>, vector<1x1x128x72xf32>
      %12 = vector.shape_cast %11 : vector<1x1x128x72xf32> to vector<128x72xf32>
      %13 = vector.shape_cast %10 : vector<128x72xf32> to vector<1x1x128x72xf32>
      tpu.vector_store %arg4[%c0_8, %c1, %c0_9, %c0_10], %13 {strides = array<i32>} : memref<1x2x128x128xf32, #tpu.memory_space<vmem>>, vector<1x1x128x72xf32>,
      %c0_11 = arith.constant 0 : index
      %c0_12 = arith.constant 0 : index
      %14 = vector.load %arg3[%c0_11, %c0_12] : memref<128x56xf32, #tpu.memory_space<vmem>>, vector<128x56xf32>
      %c0_13 = arith.constant 0 : index
      %c1_14 = arith.constant 1 : index
      %c0_15 = arith.constant 0 : index
      %c72 = arith.constant 72 : index
      %15 = vector.load %arg4[%c0_13, %c1_14, %c0_15, %c72] : memref<1x2x128x128xf32, #tpu.memory_space<vmem>>, vector<1x1x128x56xf32>
      %16 = vector.shape_cast %15 : vector<1x1x128x56xf32> to vector<128x56xf32>
      %17 = vector.shape_cast %14 : vector<128x56xf32> to vector<1x1x128x56xf32>
      tpu.vector_store %arg4[%c0_13, %c1_14, %c0_15, %c72], %17 {strides = array<i32>} : memref<1x2x128x128xf32, #tpu.memory_space<vmem>>, vector<1x1x128x56xf32>,
    } else {
    }
    %c1_i32_0 = arith.constant 1 : i32
    %3 = arith.cmpi eq, %arg0, %c1_i32_0 : i32
    %4 = arith.extui %3 : i1 to i32
    %c0_i32_1 = arith.constant 0 : i32
    %5 = arith.cmpi ne, %4, %c0_i32_1 : i32
    scf.if %5 {
      %c0 = arith.constant 0 : index
      %c0_2 = arith.constant 0 : index
      %6 = vector.load %arg2[%c0, %c0_2] : memref<128x200xf32, #tpu.memory_space<vmem>>, vector<128x128xf32>
      %c0_3 = arith.constant 0 : index
      %c0_4 = arith.constant 0 : index
      %c0_5 = arith.constant 0 : index
      %c0_6 = arith.constant 0 : index
      %7 = vector.load %arg4[%c0_3, %c0_4, %c0_5, %c0_6] : memref<1x2x128x128xf32, #tpu.memory_space<vmem>>, vector<1x1x128x128xf32>
      %8 = vector.shape_cast %7 : vector<1x1x128x128xf32> to vector<128x128xf32>
      %9 = vector.shape_cast %6 : vector<128x128xf32> to vector<1x1x128x128xf32>
      tpu.vector_store %arg4[%c0_3, %c0_4, %c0_5, %c0_6], %9 {strides = array<i32>} : memref<1x2x128x128xf32, #tpu.memory_space<vmem>>, vector<1x1x128x128xf32>,
      %c0_7 = arith.constant 0 : index
      %c128 = arith.constant 128 : index
      %10 = vector.load %arg2[%c0_7, %c128] : memref<128x200xf32, #tpu.memory_space<vmem>>, vector<128x72xf32>
      %c0_8 = arith.constant 0 : index
      %c1 = arith.constant 1 : index
      %c0_9 = arith.constant 0 : index
      %c0_10 = arith.constant 0 : index
      %11 = vector.load %arg4[%c0_8, %c1, %c0_9, %c0_10] : memref<1x2x128x128xf32, #tpu.memory_space<vmem>>, vector<1x1x128x72xf32>
      %12 = vector.shape_cast %11 : vector<1x1x128x72xf32> to vector<128x72xf32>
      %13 = vector.shape_cast %10 : vector<128x72xf32> to vector<1x1x128x72xf32>
      tpu.vector_store %arg4[%c0_8, %c1, %c0_9, %c0_10], %13 {strides = array<i32>} : memref<1x2x128x128xf32, #tpu.memory_space<vmem>>, vector<1x1x128x72xf32>,
      %c0_11 = arith.constant 0 : index
      %c0_12 = arith.constant 0 : index
      %14 = vector.load %arg3[%c0_11, %c0_12] : memref<128x56xf32, #tpu.memory_space<vmem>>, vector<128x56xf32>
      %c0_13 = arith.constant 0 : index
      %c1_14 = arith.constant 1 : index
      %c0_15 = arith.constant 0 : index
      %c72 = arith.constant 72 : index
      %15 = vector.load %arg4[%c0_13, %c1_14, %c0_15, %c72] : memref<1x2x128x128xf32, #tpu.memory_space<vmem>>, vector<1x1x128x56xf32>
      %16 = vector.shape_cast %15 : vector<1x1x128x56xf32> to vector<128x56xf32>
      %17 = vector.shape_cast %14 : vector<128x56xf32> to vector<1x1x128x56xf32>
      tpu.vector_store %arg4[%c0_13, %c1_14, %c0_15, %c72], %17 {strides = array<i32>} : memref<1x2x128x128xf32, #tpu.memory_space<vmem>>, vector<1x1x128x56xf32>,
    } else {
    }
    return
  }
  func.func @transform_0(%arg0: i32) -> (i32, i32) {
    %c0_i32 = arith.constant 0 : i32
    %0 = arith.minsi %arg0, %c0_i32 : i32
    %c0_i32_0 = arith.constant 0 : i32
    %c0_i32_1 = arith.constant 0 : i32
    return %0, %c0_i32_0 : i32, i32
  }
  func.func @transform_1(%arg0: i32) -> (i32, i32) {
    %c0_i32 = arith.constant 0 : i32
    %c0_i32_0 = arith.constant 0 : i32
    %c0_i32_1 = arith.constant 0 : i32
    return %c0_i32, %c0_i32_0 : i32, i32
  }
  func.func @transform_2(%arg0: i32) -> (i32, i32) {
    %c0_i32 = arith.constant 0 : i32
    %c0_i32_0 = arith.constant 0 : i32
    return %arg0, %c0_i32 : i32, i32
  }
  func.func @transform_3(%arg0: i32) -> (i32, i32, i32, i32) {
    %c0_i32 = arith.constant 0 : i32
    %c0_i32_0 = arith.constant 0 : i32
    %c0_i32_1 = arith.constant 0 : i32
    %c0_i32_2 = arith.constant 0 : i32
    return %arg0, %c0_i32, %c0_i32_0, %c0_i32_1 : i32, i32, i32, i32
  }
}

</mosaic_0001>

<bundles_post_ra>
// kernel: tpu_custom_call.1
= control target key start
LH: loop header
LB: loop body
LE: loop exit
PB: predicated region body
PF: predicated region fallthrough
CT: control target
= control target key end

     0   :  { %8 = vsyncpa [#allocation3], 0  ;;  %s1327_s0 = inlined_call_operand.vmem [shape: f32[160,200], index: 0, kind: input, shape index: {}]   ;;  %s1328_s1 = inlined_call_operand.vmem [shape: f32[128,200], index: 1, kind: input, shape index: {}]   ;;  %s1329_s2 = inlined_call_operand.vmem [shape: f32[256,56], index: 2, kind: input, shape index: {}]   ;;  %s1330_s3 = inlined_call_operand.hbm [shape: f32[2,2,128,128], index: 3, kind: output, shape index: {}]  }
   0x1   :  { %10 = vsyncpa [#allocation3 + $0x1], 0  ;;  %s873_s12 = smov 0   ;;  %s875_s13 = smov 0  }
   0x2   :  { %s877_s14 = smov 0   ;;  %s879_s15 = smov 0  }
   0x3 LB: > { %s894_s16 = sadd.s32 4294967295, %s847_s15   ;;  %s659_s17 = sadd.s32 4294967294, %s847_s15   ;;  %s847_s15 = sphi %s879_s15, %s1336_s15   ;;  %s843_s14 = sphi %s877_s14, %s1335_s14   ;;  %s839_s13 = sphi %s875_s13, %s1334_s13   ;;  %s835_s12 = sphi %s873_s12, %s1333_s12  }
   0x4   : > { %s898_s18 = sadd.s32 1, %s847_s15   ;;  %s100_s19 = sadd.s32 1, %s843_s14 }
   0x5   : > { %s97_s20 = ssub.s32 %s847_s15, %s898_s18  ;;  %p110_p0 = scmp.ne.s32.totalorder %s843_s14, %s839_s13 }
   0x6   : > { %p98_p1 = scmp.eq.s32.totalorder %s97_s20, 0  ;;  %p111_p2 = scmp.eq.s32.totalorder %s894_s16, 1 }
   0x7   : > { %p116_p3 = scmp.ne.s32.totalorder %s839_s13, %s835_s12  ;;  %p117_p4 = scmp.eq.s32.totalorder %s659_s17, 1 }
   0x8   : > { %s909_s21 = scalar_select %p98_p1, %s843_s14, %s100_s19  }
   0x9   : > { %p911_p5 = por %p111_p2, %p110_p0  ;;  %p915_p6 = por %p117_p4, %p116_p3 }
   0xa   : > { %p662_p7 = scmp.ge.s32.totalorder %s847_s15, 1  ;;  %p171_p8 = scmp.lt.s32.totalorder %s847_s15, 3 }
   0xc   : > { %p172_p9 = pnand %p662_p7, %p171_p8 }
   0xd   : > { %s205_s24 = sand.u32 (!%p172_p9), 1, %s839_s13   ;;  %p208_p10 = scmp.lt.s32.totalorder (!%p172_p9), %s894_s16, 0 }
   0xe   : > { %175 = sbr.rel (%p172_p9) target bundleno = 365 (0x16d), region = 32  ;;  %s663_s25 = sshll.u32 (!%p172_p9), %s205_s24, 8 }
   0xf   : > { %s667_s26 = sshll.u32 (!%p172_p9), %s894_s16, 4  ;;  %s937_s10 = scalar_lea.vmem (!%p172_p9), [#allocation2], %s663_s25 }
  0x10   : > { %p230_p11 = scmp.lt.s32.totalorder (!%p172_p9), %s667_s26, 31  ;;  %p669_p13 = scmp.ge.s32.totalorder (!%p172_p9), %s894_s16, 1 }
  0x13   : > { %s209_s27 = scalar_select %p208_p10, %s894_s16, 0 }
  0x14   : > { %s1338_s26 = smov (!%p230_p11, %s667_s26), 31  ;;  %s849_s11 = smov (!%p669_p13), 72  }
  0x15   : > { %s664_s28 = sshll.u32 %s209_s27, 4  ;;  %s668_s29 = sshll.u32 %s1338_s26, 3 }
  0x16   : > { %p216_p12 = scmp.lt.s32.totalorder %s664_s28, 19  ;;  %s930_s5 = scalar_lea.vmem %s1329_s2, %s668_s29 }
  0x17   : > { %238 = sbr.rel (%p669_p13) target bundleno = 185 (0xb9), region = 36 }
  0x18   : > { %s1340_s28 = smov (!%p216_p12, %s664_s28), 19 }
  0x19   : > { %s740_s6 = sshll.u32 %s1340_s28, 4 }
  0x1a   : > { %s935_s9 = scalar_lea.vmem %s1327_s0, %s740_s6 }
  0x1c   : > { %v305_v0 = vld [vmem:[%s930_s5] sm:$0xff]  ;;  %v307_v1 = vld [vmem:[%s930_s5 + $0x10] sm:$0xff]  ;;  %v306_v3 = vld [vmem:[%s930_s5 + $0x8] sm:$0xff]  ;;  %vm288_vm0 = vcmask 588800   ;;  %vm385_vm1 = vcmask 1048128  }
  0x1d   : > { %337 = vrot.lane.b32.xlu0 %v305_v0, %s849_s11  ;;  %341 = vrot.lane.b32.xlu1 %v307_v1, %s849_s11  ;;  %v309_v2 = vld [vmem:[%s930_s5 + $0x20] sm:$0xff]  ;;  %v308_v4 = vld [vmem:[%s930_s5 + $0x18] sm:$0xff] }
  0x1e   : > { %345 = vrot.lane.b32.xlu2 %v309_v2, %s849_s11  ;;  %v310_v5 = vld [vmem:[%s930_s5 + $0x28] sm:$0xff]  ;;  %v311_v6 = vld [vmem:[%s930_s5 + $0x30] sm:$0xff]  ;;  %v312_v7 = vld [vmem:[%s930_s5 + $0x38] sm:$0xff] }
  0x1f   : > { %v313_v8 = vld [vmem:[%s930_s5 + $0x40] sm:$0xff]  ;;  %v314_v9 = vld [vmem:[%s930_s5 + $0x48] sm:$0xff]  ;;  %v315_v10 = vld [vmem:[%s930_s5 + $0x50] sm:$0xff] }
  0x20   : > { %v316_v11 = vld [vmem:[%s930_s5 + $0x58] sm:$0xff]  ;;  %v317_v12 = vld [vmem:[%s930_s5 + $0x60] sm:$0xff]  ;;  %v318_v13 = vld [vmem:[%s930_s5 + $0x68] sm:$0xff] }
  0x21   : > { %v319_v14 = vld [vmem:[%s930_s5 + $0x70] sm:$0xff]  ;;  %v320_v15 = vld [vmem:[%s930_s5 + $0x78] sm:$0xff]  ;;  %v271_v16 = vld [vmem:[%s935_s9 + $0x8] sm:$0xff] }
  0x22   : > { %670 = vst.msk [vmem:[%s937_s10 + $0x80] sm:$0xff] %vm288_vm0, %v271_v16  ;;  %v275_v17 = vld [vmem:[%s935_s9 + $0x48] sm:$0xff]  ;;  %v272_v19 = vld [vmem:[%s935_s9 + $0x18] sm:$0xff]  ;;  %v239_v40 = vld [vmem:[%s935_s9] sm:$0xff] }
  0x23   : > { %v273_v18 = vld [vmem:[%s935_s9 + $0x28] sm:$0xff]  ;;  %674 = vst.msk [vmem:[%s937_s10 + $0xa0] sm:$0xff] %vm288_vm0, %v275_v17  ;;  %v276_v20 = vld [vmem:[%s935_s9 + $0x58] sm:$0xff]  ;;  %v240_v42 = vld [vmem:[%s935_s9 + $0x10] sm:$0xff] }
  0x24   : > { %672 = vst.msk [vmem:[%s937_s10 + $0x90] sm:$0xff] %vm288_vm0, %v273_v18  ;;  %v274_v21 = vld [vmem:[%s935_s9 + $0x38] sm:$0xff]  ;;  %v277_v23 = vld [vmem:[%s935_s9 + $0x68] sm:$0xff]  ;;  %v241_v43 = vld [vmem:[%s935_s9 + $0x20] sm:$0xff] }
  0x25   : > { %339 = vrot.lane.b32.xlu0 %v306_v3, %s849_s11  ;;  %343 = vrot.lane.b32.xlu1 %v308_v4, %s849_s11  ;;  %671 = vst.msk [vmem:[%s937_s10 + $0x88] sm:$0xff] %vm288_vm0, %v272_v19  ;;  %v279_v24 = vld [vmem:[%s935_s9 + $0x88] sm:$0xff] }
  0x26   : > { %347 = vrot.lane.b32.xlu2 %v310_v5, %s849_s11  ;;  %675 = vst.msk [vmem:[%s937_s10 + $0xa8] sm:$0xff] %vm288_vm0, %v276_v20  ;;  %v278_v25 = vld [vmem:[%s935_s9 + $0x78] sm:$0xff]  ;;  %v281_v29 = vld [vmem:[%s935_s9 + $0xa8] sm:$0xff] }
  0x27   : > { %673 = vst.msk [vmem:[%s937_s10 + $0x98] sm:$0xff] %vm288_vm0, %v274_v21  ;;  %v280_v27 = vld [vmem:[%s935_s9 + $0x98] sm:$0xff]  ;;  %v283_v31 = vld [vmem:[%s935_s9 + $0xc8] sm:$0xff]  ;;  %v242_v44 = vld [vmem:[%s935_s9 + $0x30] sm:$0xff] }
  0x28   : > { %676 = vst.msk [vmem:[%s937_s10 + $0xb0] sm:$0xff] %vm288_vm0, %v277_v23  ;;  %v282_v28 = vld [vmem:[%s935_s9 + $0xb8] sm:$0xff]  ;;  %v285_v34 = vld [vmem:[%s935_s9 + $0xe8] sm:$0xff]  ;;  %v243_v45 = vld [vmem:[%s935_s9 + $0x40] sm:$0xff] }
  0x29   : > { %678 = vst.msk [vmem:[%s937_s10 + $0xc0] sm:$0xff] %vm288_vm0, %v279_v24  ;;  %v284_v36 = vld [vmem:[%s935_s9 + $0xd8] sm:$0xff]  ;;  %v244_v48 = vld [vmem:[%s935_s9 + $0x50] sm:$0xff]  ;;  %v245_v49 = vld [vmem:[%s935_s9 + $0x60] sm:$0xff] }
  0x2a   : > { %677 = vst.msk [vmem:[%s937_s10 + $0xb8] sm:$0xff] %vm288_vm0, %v278_v25  ;;  %v286_v37 = vld [vmem:[%s935_s9 + $0xf8] sm:$0xff]  ;;  %v246_v50 = vld [vmem:[%s935_s9 + $0x70] sm:$0xff]  ;;  %v247_v51 = vld [vmem:[%s935_s9 + $0x80] sm:$0xff] }
  0x2b   : > { %679 = vst.msk [vmem:[%s937_s10 + $0xc8] sm:$0xff] %vm288_vm0, %v280_v27  ;;  %v248_v52 = vld [vmem:[%s935_s9 + $0x90] sm:$0xff]  ;;  %v249_v53 = vld [vmem:[%s935_s9 + $0xa0] sm:$0xff] }
  0x2c   : > { %681 = vst.msk [vmem:[%s937_s10 + $0xd8] sm:$0xff] %vm288_vm0, %v282_v28  ;;  %v250_v56 = vld [vmem:[%s935_s9 + $0xb0] sm:$0xff]  ;;  %v251_v57 = vld [vmem:[%s935_s9 + $0xc0] sm:$0xff] }
  0x2d   : > { %349 = vrot.lane.b32.xlu0 %v311_v6, %s849_s11  ;;  %351 = vrot.lane.b32.xlu1 %v312_v7, %s849_s11  ;;  %680 = vst.msk [vmem:[%s937_s10 + $0xd0] sm:$0xff] %vm288_vm0, %v281_v29  ;;  %v252_v58 = vld [vmem:[%s935_s9 + $0xd0] sm:$0xff] }
  0x2e   : > { %353 = vrot.lane.b32.xlu2 %v313_v8, %s849_s11  ;;  %682 = vst.msk [vmem:[%s937_s10 + $0xe0] sm:$0xff] %vm288_vm0, %v283_v31  ;;  %v253_v59 = vld [vmem:[%s935_s9 + $0xe0] sm:$0xff]  ;;  %v254_v60 = vld [vmem:[%s935_s9 + $0xf0] sm:$0xff] }
  0x2f   : > { %684 = vst.msk [vmem:[%s937_s10 + $0xf0] sm:$0xff] %vm288_vm0, %v285_v34 }
  0x30   : > { %683 = vst.msk [vmem:[%s937_s10 + $0xe8] sm:$0xff] %vm288_vm0, %v284_v36 }
  0x31   : > { %685 = vst.msk [vmem:[%s937_s10 + $0xf8] sm:$0xff] %vm288_vm0, %v286_v37 }
  0x32   : > { %255 = vst [vmem:[%s937_s10] sm:$0xff] %v239_v40 }
  0x33   : > { %256 = vst [vmem:[%s937_s10 + $0x8] sm:$0xff] %v240_v42 }
  0x34   : > { %257 = vst [vmem:[%s937_s10 + $0x10] sm:$0xff] %v241_v43 }
  0x35   : > { %355 = vrot.lane.b32.xlu0 %v314_v9, %s849_s11  ;;  %357 = vrot.lane.b32.xlu1 %v315_v10, %s849_s11  ;;  %258 = vst [vmem:[%s937_s10 + $0x18] sm:$0xff] %v242_v44 }
  0x36   : > { %359 = vrot.lane.b32.xlu2 %v316_v11, %s849_s11  ;;  %259 = vst [vmem:[%s937_s10 + $0x20] sm:$0xff] %v243_v45 }
  0x37   : > { %260 = vst [vmem:[%s937_s10 + $0x28] sm:$0xff] %v244_v48 }
  0x38   : > { %261 = vst [vmem:[%s937_s10 + $0x30] sm:$0xff] %v245_v49 }
  0x39   : > { %262 = vst [vmem:[%s937_s10 + $0x38] sm:$0xff] %v246_v50 }
  0x3a   : > { %263 = vst [vmem:[%s937_s10 + $0x40] sm:$0xff] %v247_v51 }
  0x3b   : > { %264 = vst [vmem:[%s937_s10 + $0x48] sm:$0xff] %v248_v52 }
  0x3c   : > { %265 = vst [vmem:[%s937_s10 + $0x50] sm:$0xff] %v249_v53 }
  0x3d   : > { %361 = vrot.lane.b32.xlu0 %v317_v12, %s849_s11  ;;  %363 = vrot.lane.b32.xlu1 %v318_v13, %s849_s11  ;;  %266 = vst [vmem:[%s937_s10 + $0x58] sm:$0xff] %v250_v56 }
  0x3e   : > { %365 = vrot.lane.b32.xlu2 %v319_v14, %s849_s11  ;;  %267 = vst [vmem:[%s937_s10 + $0x60] sm:$0xff] %v251_v57 }
  0x3f   : > { %268 = vst [vmem:[%s937_s10 + $0x68] sm:$0xff] %v252_v58 }
  0x40   : > { %269 = vst [vmem:[%s937_s10 + $0x70] sm:$0xff] %v253_v59 }
  0x41   : > { %270 = vst [vmem:[%s937_s10 + $0x78] sm:$0xff] %v254_v60 }
  0x45   : > { %367 = vrot.lane.b32.xlu0 %v320_v15, %s849_s11 }
  0x78   : > { %v346_v22 = vpop.permute.xlu2 %345 }
  0x79   : > { %690 = vst.msk [vmem:[%s937_s10 + $0xa0] sm:$0xff] %vm385_vm1, %v346_v22 }
  0x80   : > { %v348_v26 = vpop.permute.xlu2 %347 }
  0x81   : > { %691 = vst.msk [vmem:[%s937_s10 + $0xa8] sm:$0xff] %vm385_vm1, %v348_v26 }
  0x88   : > { %v354_v30 = vpop.permute.xlu2 %353 }
  0x89   : > { %694 = vst.msk [vmem:[%s937_s10 + $0xc0] sm:$0xff] %vm385_vm1, %v354_v30 }
  0x8f   : > { %v338_v32 = vpop.permute.xlu0 %337  ;;  %v342_v33 = vpop.permute.xlu1 %341 }
  0x90   : > { %686 = vst.msk [vmem:[%s937_s10 + $0x80] sm:$0xff] %vm385_vm1, %v338_v32  ;;  %v360_v35 = vpop.permute.xlu2 %359 }
  0x91   : > { %688 = vst.msk [vmem:[%s937_s10 + $0x90] sm:$0xff] %vm385_vm1, %v342_v33 }
  0x92   : > { %697 = vst.msk [vmem:[%s937_s10 + $0xd8] sm:$0xff] %vm385_vm1, %v360_v35 }
  0x97   : > { %v340_v38 = vpop.permute.xlu0 %339  ;;  %v344_v39 = vpop.permute.xlu1 %343 }
  0x98   : > { %687 = vst.msk [vmem:[%s937_s10 + $0x88] sm:$0xff] %vm385_vm1, %v340_v38  ;;  %v366_v41 = vpop.permute.xlu2 %365 }
  0x99   : > { %689 = vst.msk [vmem:[%s937_s10 + $0x98] sm:$0xff] %vm385_vm1, %v344_v39 }
  0x9a   : > { %700 = vst.msk [vmem:[%s937_s10 + $0xf0] sm:$0xff] %vm385_vm1, %v366_v41 }
  0x9f   : > { %v350_v46 = vpop.permute.xlu0 %349  ;;  %v352_v47 = vpop.permute.xlu1 %351 }
  0xa0   : > { %692 = vst.msk [vmem:[%s937_s10 + $0xb0] sm:$0xff] %vm385_vm1, %v350_v46 }
  0xa1   : > { %693 = vst.msk [vmem:[%s937_s10 + $0xb8] sm:$0xff] %vm385_vm1, %v352_v47 }
  0xa7   : > { %v356_v54 = vpop.permute.xlu0 %355  ;;  %v358_v55 = vpop.permute.xlu1 %357 }
  0xa8   : > { %695 = vst.msk [vmem:[%s937_s10 + $0xc8] sm:$0xff] %vm385_vm1, %v356_v54 }
  0xa9   : > { %696 = vst.msk [vmem:[%s937_s10 + $0xd0] sm:$0xff] %vm385_vm1, %v358_v55 }
  0xaf   : > { %v362_v61 = vpop.permute.xlu0 %361  ;;  %v364_v62 = vpop.permute.xlu1 %363 }
  0xb0   : > { %698 = vst.msk [vmem:[%s937_s10 + $0xe0] sm:$0xff] %vm385_vm1, %v362_v61 }
  0xb1   : > { %699 = vst.msk [vmem:[%s937_s10 + $0xe8] sm:$0xff] %vm385_vm1, %v364_v62 }
  0xb7   : > { %v368_v63 = vpop.permute.xlu0 %367 }
  0xb8   : > { %701 = vst.msk [vmem:[%s937_s10 + $0xf8] sm:$0xff] %vm385_vm1, %v368_v63 }
  0xb9 PF: > { %p702_p0 = scmp.ne.s32.totalorder %s894_s16, 1 }
  0xba   : > { %s850_s17 = smov (!%p702_p0), 72  }
  0xbb   : > { %405 = sbr.rel (%p702_p0) target bundleno = 349 (0x15d), region = 40 }
  0xc0   : > { %v472_v0 = vld [vmem:[%s930_s5] sm:$0xff]  ;;  %v474_v1 = vld [vmem:[%s930_s5 + $0x10] sm:$0xff]  ;;  %v473_v3 = vld [vmem:[%s930_s5 + $0x8] sm:$0xff]  ;;  %vm455_vm2 = vcmask 588800   ;;  %vm552_vm3 = vcmask 1048128  }
  0xc1   : > { %504 = vrot.lane.b32.xlu0 %v472_v0, %s850_s17  ;;  %508 = vrot.lane.b32.xlu1 %v474_v1, %s850_s17  ;;  %v476_v2 = vld [vmem:[%s930_s5 + $0x20] sm:$0xff]  ;;  %v475_v4 = vld [vmem:[%s930_s5 + $0x18] sm:$0xff] }
  0xc2   : > { %512 = vrot.lane.b32.xlu2 %v476_v2, %s850_s17  ;;  %v477_v5 = vld [vmem:[%s930_s5 + $0x28] sm:$0xff]  ;;  %v478_v6 = vld [vmem:[%s930_s5 + $0x30] sm:$0xff]  ;;  %v479_v7 = vld [vmem:[%s930_s5 + $0x38] sm:$0xff] }
  0xc3   : > { %v480_v8 = vld [vmem:[%s930_s5 + $0x40] sm:$0xff]  ;;  %v481_v9 = vld [vmem:[%s930_s5 + $0x48] sm:$0xff]  ;;  %v482_v10 = vld [vmem:[%s930_s5 + $0x50] sm:$0xff] }
  0xc4   : > { %v483_v11 = vld [vmem:[%s930_s5 + $0x58] sm:$0xff]  ;;  %v484_v12 = vld [vmem:[%s930_s5 + $0x60] sm:$0xff]  ;;  %v485_v13 = vld [vmem:[%s930_s5 + $0x68] sm:$0xff] }
  0xc5   : > { %v486_v14 = vld [vmem:[%s930_s5 + $0x70] sm:$0xff]  ;;  %v487_v15 = vld [vmem:[%s930_s5 + $0x78] sm:$0xff]  ;;  %v438_v16 = vld [vmem:[%s1328_s1 + $0x8] sm:$0xff] }
  0xc6   : > { %703 = vst.msk [vmem:[%s937_s10 + $0x80] sm:$0xff] %vm455_vm2, %v438_v16  ;;  %v442_v17 = vld [vmem:[%s1328_s1 + $0x48] sm:$0xff]  ;;  %v439_v19 = vld [vmem:[%s1328_s1 + $0x18] sm:$0xff]  ;;  %v406_v40 = vld [vmem:[%s1328_s1] sm:$0xff] }
  0xc7   : > { %v440_v18 = vld [vmem:[%s1328_s1 + $0x28] sm:$0xff]  ;;  %707 = vst.msk [vmem:[%s937_s10 + $0xa0] sm:$0xff] %vm455_vm2, %v442_v17  ;;  %v443_v20 = vld [vmem:[%s1328_s1 + $0x58] sm:$0xff]  ;;  %v407_v42 = vld [vmem:[%s1328_s1 + $0x10] sm:$0xff] }
  0xc8   : > { %705 = vst.msk [vmem:[%s937_s10 + $0x90] sm:$0xff] %vm455_vm2, %v440_v18  ;;  %v441_v21 = vld [vmem:[%s1328_s1 + $0x38] sm:$0xff]  ;;  %v444_v23 = vld [vmem:[%s1328_s1 + $0x68] sm:$0xff]  ;;  %v408_v43 = vld [vmem:[%s1328_s1 + $0x20] sm:$0xff] }
  0xc9   : > { %506 = vrot.lane.b32.xlu0 %v473_v3, %s850_s17  ;;  %510 = vrot.lane.b32.xlu1 %v475_v4, %s850_s17  ;;  %704 = vst.msk [vmem:[%s937_s10 + $0x88] sm:$0xff] %vm455_vm2, %v439_v19  ;;  %v446_v24 = vld [vmem:[%s1328_s1 + $0x88] sm:$0xff] }
  0xca   : > { %514 = vrot.lane.b32.xlu2 %v477_v5, %s850_s17  ;;  %708 = vst.msk [vmem:[%s937_s10 + $0xa8] sm:$0xff] %vm455_vm2, %v443_v20  ;;  %v445_v25 = vld [vmem:[%s1328_s1 + $0x78] sm:$0xff]  ;;  %v448_v29 = vld [vmem:[%s1328_s1 + $0xa8] sm:$0xff] }
  0xcb   : > { %706 = vst.msk [vmem:[%s937_s10 + $0x98] sm:$0xff] %vm455_vm2, %v441_v21  ;;  %v447_v27 = vld [vmem:[%s1328_s1 + $0x98] sm:$0xff]  ;;  %v450_v31 = vld [vmem:[%s1328_s1 + $0xc8] sm:$0xff]  ;;  %v409_v44 = vld [vmem:[%s1328_s1 + $0x30] sm:$0xff] }
  0xcc   : > { %709 = vst.msk [vmem:[%s937_s10 + $0xb0] sm:$0xff] %vm455_vm2, %v444_v23  ;;  %v449_v28 = vld [vmem:[%s1328_s1 + $0xb8] sm:$0xff]  ;;  %v452_v34 = vld [vmem:[%s1328_s1 + $0xe8] sm:$0xff]  ;;  %v410_v45 = vld [vmem:[%s1328_s1 + $0x40] sm:$0xff] }
  0xcd   : > { %711 = vst.msk [vmem:[%s937_s10 + $0xc0] sm:$0xff] %vm455_vm2, %v446_v24  ;;  %v451_v36 = vld [vmem:[%s1328_s1 + $0xd8] sm:$0xff]  ;;  %v411_v48 = vld [vmem:[%s1328_s1 + $0x50] sm:$0xff]  ;;  %v412_v49 = vld [vmem:[%s1328_s1 + $0x60] sm:$0xff] }
  0xce   : > { %710 = vst.msk [vmem:[%s937_s10 + $0xb8] sm:$0xff] %vm455_vm2, %v445_v25  ;;  %v453_v37 = vld [vmem:[%s1328_s1 + $0xf8] sm:$0xff]  ;;  %v413_v50 = vld [vmem:[%s1328_s1 + $0x70] sm:$0xff]  ;;  %v414_v51 = vld [vmem:[%s1328_s1 + $0x80] sm:$0xff] }
  0xcf   : > { %712 = vst.msk [vmem:[%s937_s10 + $0xc8] sm:$0xff] %vm455_vm2, %v447_v27  ;;  %v415_v52 = vld [vmem:[%s1328_s1 + $0x90] sm:$0xff]  ;;  %v416_v53 = vld [vmem:[%s1328_s1 + $0xa0] sm:$0xff] }
  0xd0   : > { %714 = vst.msk [vmem:[%s937_s10 + $0xd8] sm:$0xff] %vm455_vm2, %v449_v28  ;;  %v417_v56 = vld [vmem:[%s1328_s1 + $0xb0] sm:$0xff]  ;;  %v418_v57 = vld [vmem:[%s1328_s1 + $0xc0] sm:$0xff] }
  0xd1   : > { %516 = vrot.lane.b32.xlu0 %v478_v6, %s850_s17  ;;  %518 = vrot.lane.b32.xlu1 %v479_v7, %s850_s17  ;;  %713 = vst.msk [vmem:[%s937_s10 + $0xd0] sm:$0xff] %vm455_vm2, %v448_v29  ;;  %v419_v58 = vld [vmem:[%s1328_s1 + $0xd0] sm:$0xff] }
  0xd2   : > { %520 = vrot.lane.b32.xlu2 %v480_v8, %s850_s17  ;;  %715 = vst.msk [vmem:[%s937_s10 + $0xe0] sm:$0xff] %vm455_vm2, %v450_v31  ;;  %v420_v59 = vld [vmem:[%s1328_s1 + $0xe0] sm:$0xff]  ;;  %v421_v60 = vld [vmem:[%s1328_s1 + $0xf0] sm:$0xff] }
  0xd3   : > { %717 = vst.msk [vmem:[%s937_s10 + $0xf0] sm:$0xff] %vm455_vm2, %v452_v34 }
  0xd4   : > { %716 = vst.msk [vmem:[%s937_s10 + $0xe8] sm:$0xff] %vm455_vm2, %v451_v36 }
  0xd5   : > { %718 = vst.msk [vmem:[%s937_s10 + $0xf8] sm:$0xff] %vm455_vm2, %v453_v37 }
  0xd6   : > { %422 = vst [vmem:[%s937_s10] sm:$0xff] %v406_v40 }
  0xd7   : > { %423 = vst [vmem:[%s937_s10 + $0x8] sm:$0xff] %v407_v42 }
  0xd8   : > { %424 = vst [vmem:[%s937_s10 + $0x10] sm:$0xff] %v408_v43 }
  0xd9   : > { %522 = vrot.lane.b32.xlu0 %v481_v9, %s850_s17  ;;  %524 = vrot.lane.b32.xlu1 %v482_v10, %s850_s17  ;;  %425 = vst [vmem:[%s937_s10 + $0x18] sm:$0xff] %v409_v44 }
  0xda   : > { %526 = vrot.lane.b32.xlu2 %v483_v11, %s850_s17  ;;  %426 = vst [vmem:[%s937_s10 + $0x20] sm:$0xff] %v410_v45 }
  0xdb   : > { %427 = vst [vmem:[%s937_s10 + $0x28] sm:$0xff] %v411_v48 }
  0xdc   : > { %428 = vst [vmem:[%s937_s10 + $0x30] sm:$0xff] %v412_v49 }
  0xdd   : > { %429 = vst [vmem:[%s937_s10 + $0x38] sm:$0xff] %v413_v50 }
  0xde   : > { %430 = vst [vmem:[%s937_s10 + $0x40] sm:$0xff] %v414_v51 }
  0xdf   : > { %431 = vst [vmem:[%s937_s10 + $0x48] sm:$0xff] %v415_v52 }
  0xe0   : > { %432 = vst [vmem:[%s937_s10 + $0x50] sm:$0xff] %v416_v53 }
  0xe1   : > { %528 = vrot.lane.b32.xlu0 %v484_v12, %s850_s17  ;;  %530 = vrot.lane.b32.xlu1 %v485_v13, %s850_s17  ;;  %433 = vst [vmem:[%s937_s10 + $0x58] sm:$0xff] %v417_v56 }
  0xe2   : > { %532 = vrot.lane.b32.xlu2 %v486_v14, %s850_s17  ;;  %434 = vst [vmem:[%s937_s10 + $0x60] sm:$0xff] %v418_v57 }
  0xe3   : > { %435 = vst [vmem:[%s937_s10 + $0x68] sm:$0xff] %v419_v58 }
  0xe4   : > { %436 = vst [vmem:[%s937_s10 + $0x70] sm:$0xff] %v420_v59 }
  0xe5   : > { %437 = vst [vmem:[%s937_s10 + $0x78] sm:$0xff] %v421_v60 }
  0xe9   : > { %534 = vrot.lane.b32.xlu0 %v487_v15, %s850_s17 }
 0x11c   : > { %v513_v22 = vpop.permute.xlu2 %512 }
 0x11d   : > { %723 = vst.msk [vmem:[%s937_s10 + $0xa0] sm:$0xff] %vm552_vm3, %v513_v22 }
 0x124   : > { %v515_v26 = vpop.permute.xlu2 %514 }
 0x125   : > { %724 = vst.msk [vmem:[%s937_s10 + $0xa8] sm:$0xff] %vm552_vm3, %v515_v26 }
 0x12c   : > { %v521_v30 = vpop.permute.xlu2 %520 }
 0x12d   : > { %727 = vst.msk [vmem:[%s937_s10 + $0xc0] sm:$0xff] %vm552_vm3, %v521_v30 }
 0x133   : > { %v505_v32 = vpop.permute.xlu0 %504  ;;  %v509_v33 = vpop.permute.xlu1 %508 }
 0x134   : > { %719 = vst.msk [vmem:[%s937_s10 + $0x80] sm:$0xff] %vm552_vm3, %v505_v32  ;;  %v527_v35 = vpop.permute.xlu2 %526 }
 0x135   : > { %721 = vst.msk [vmem:[%s937_s10 + $0x90] sm:$0xff] %vm552_vm3, %v509_v33 }
 0x136   : > { %730 = vst.msk [vmem:[%s937_s10 + $0xd8] sm:$0xff] %vm552_vm3, %v527_v35 }
 0x13b   : > { %v507_v38 = vpop.permute.xlu0 %506  ;;  %v511_v39 = vpop.permute.xlu1 %510 }
 0x13c   : > { %720 = vst.msk [vmem:[%s937_s10 + $0x88] sm:$0xff] %vm552_vm3, %v507_v38  ;;  %v533_v41 = vpop.permute.xlu2 %532 }
 0x13d   : > { %722 = vst.msk [vmem:[%s937_s10 + $0x98] sm:$0xff] %vm552_vm3, %v511_v39 }
 0x13e   : > { %733 = vst.msk [vmem:[%s937_s10 + $0xf0] sm:$0xff] %vm552_vm3, %v533_v41 }
 0x143   : > { %v517_v46 = vpop.permute.xlu0 %516  ;;  %v519_v47 = vpop.permute.xlu1 %518 }
 0x144   : > { %725 = vst.msk [vmem:[%s937_s10 + $0xb0] sm:$0xff] %vm552_vm3, %v517_v46 }
 0x145   : > { %726 = vst.msk [vmem:[%s937_s10 + $0xb8] sm:$0xff] %vm552_vm3, %v519_v47 }
 0x14b   : > { %v523_v54 = vpop.permute.xlu0 %522  ;;  %v525_v55 = vpop.permute.xlu1 %524 }
 0x14c   : > { %728 = vst.msk [vmem:[%s937_s10 + $0xc8] sm:$0xff] %vm552_vm3, %v523_v54 }
 0x14d   : > { %729 = vst.msk [vmem:[%s937_s10 + $0xd0] sm:$0xff] %vm552_vm3, %v525_v55 }
 0x153   : > { %v529_v61 = vpop.permute.xlu0 %528  ;;  %v531_v62 = vpop.permute.xlu1 %530 }
 0x154   : > { %731 = vst.msk [vmem:[%s937_s10 + $0xe0] sm:$0xff] %vm552_vm3, %v529_v61 }
 0x155   : > { %732 = vst.msk [vmem:[%s937_s10 + $0xe8] sm:$0xff] %vm552_vm3, %v531_v62 }
 0x15b   : > { %v535_v63 = vpop.permute.xlu0 %534 }
 0x15c   : > { %734 = vst.msk [vmem:[%s937_s10 + $0xf8] sm:$0xff] %vm552_vm3, %v535_v63 }
 0x15d PF: > { %s741_s19 = sshll.u32 %s894_s16, 8  ;;  %s582_s27 = sshll.u32 %s937_s10, 4  ;;  %s583_s27 = int_to_ptr.vmem [resolvable:$true] %s582_s27 }
 0x15e   : > { %s581_s26 = scalar_lea.hbm %s1330_s3, %s741_s19  ;;  %s570_s29 = scalar_lea.sflag [#allocation3], %s205_s24 }
 0x15f   : > { %s584_s28 = sshll.u32 %s581_s26, 4  ;;  %s805_s16 = scalar_lea.hbm %s1330_s3, 512  ;;  %s585_s28 = int_to_ptr.hbm [resolvable:$true] %s584_s28 }
 0x160   : > { %s799_s30 = sshra.s32 %s585_s28, 4  ;;  %s800_s30 = int_to_ptr.hbm [resolvable:$true] %s799_s30 }
 0x161   : > { %s801_s4 = scalar_lea.hbm %s800_s30, 256  ;;  %p806_p4 = scmp.lt.s32.totalorder %s800_s30, %s1330_s3 }
 0x162   : > { %p802_p1 = scmp.ne.s32.totalorder %s800_s30, %s801_s4  ;;  %p807_p7 = scmp.lt.s32.totalorder %s805_s16, %s801_s4 }
 0x164   : > { %p803_p2 = pnand %p802_p1, %p911_p5  ;;  %p808_p8 = por %p807_p7, %p806_p4 }
 0x166   : > { %p804_p3 = pneg %p803_p2 }
 0x168   : > { %p809_p9 = pnand %p808_p8, %p804_p3 }
 0x16a   : > { %812 = shalt.err (!%p809_p9)
}
 0x16b   : > { %s851_s24 = smov 128   ;;  %s852_s10 = smov 8  }
 0x16c   : > { %742 = dma.vmem_to_hbm [thread:$0]  (%p911_p5), %s583_s27, 4096, %s585_s28, %s570_s29, %s851_s24, %s851_s24, %s852_s10  }
 0x16d PF: > { %p748_p10 = scmp.ge.s32.totalorder %s847_s15, 2  ;;  %s599_s9 = sand.u32 1, %s835_s12  }
 0x16e   : > { %s600_s11 = scalar_lea.sflag [#allocation3], %s599_s9 }
 0x16f   : > { %p745_p11 = pnand %p748_p10, %p915_p6 }
 0x171   : > { %p746_p12 = pneg %p745_p11 }
 0x173   : > { %830 = dma.done.wait (%p746_p12), %s600_s11, 4096  }
 0x174   : > { %832 = vsyncadd (%p746_p12), %s600_s11, 4294963200  ;;  %p13_p13 = scmp.ge.s32.totalorder %s898_s18, 4   ;;  %s1333_s12 = smov %s839_s13 }
 0x175   : > { %s1334_s13 = smov %s843_s14  ;;  %s1335_s14 = smov %s909_s21 }
 0x176   : > { %s1336_s15 = smov %s898_s18  ;;  %15 = sbr.rel (!%p13_p13) target bundleno = 3 (0x3), region = 80 }
 0x17b   :  { %606 = vsyncpa [#allocation3], 1 }
 0x17c   :  { %608 = vsyncpa [#allocation3 + $0x1], 1 }

</bundles_post_ra>
